<compile_context>
chip_gen: v7x
topology: tpu7x:2x2x1
jax: 0.10.0
libtpu: 0.0.40
codegen_flags: <defaults>
</compile_context>

<pallas_src>
import jax
import jax.numpy as jnp
from jax import lax
from jax.experimental import pallas as pl
from jax.experimental.pallas import tpu as pltpu


def _round_up(x, m):
    return ((x + m - 1) // m) * m


def _vmem_capacity_bytes():
    try:
        info = pltpu.get_tpu_info()
        return int(getattr(info, "vmem_capacity_bytes", 128 * 1024 * 1024))
    except Exception:
        return 128 * 1024 * 1024


def _choose_block_rows(n, c):
    # Size the logits block in bytes (f32-expanded footprint), not rows.
    # v7x has only 64 MiB physical VMEM per TensorCore -> smaller blocks and a
    # lower scoped-VMEM request than v5e/v6e (128 MiB physical).
    if _vmem_capacity_bytes() <= 64 * 1024 * 1024:          # v7x-class
        budget_f32, vmem_limit = 4 * 1024 * 1024, 32 * 1024 * 1024
    else:                                                   # v5e / v6e
        budget_f32, vmem_limit = 8 * 1024 * 1024, 64 * 1024 * 1024
    tm = budget_f32 // max(1, c * 4)
    tm = max(8, (tm // 8) * 8)
    tm = min(tm, _round_up(n, 8))
    return tm, vmem_limit


def _make_kernel(n_rows, tm, c, blocks_per_core, use_bf16_exp, in_dtype):
    is_bf16 = jnp.dtype(in_dtype) == jnp.dtype(jnp.bfloat16)
    mxu_aligned = (c % 128 == 0)
    gather_on_mxu = is_bf16 and mxu_aligned       # exact: one non-zero per row

    def kernel(x_ref, t_ref, m_ref, o_ref):
        p = pl.program_id(0)          # parallel (TensorCore) axis
        i = pl.program_id(1)          # row-block reduction axis

        @pl.when(i == 0)
        def _init():
            o_ref[...] = jnp.zeros_like(o_ref)

        # Row-validity for the ragged tail block (and for the clamped
        # duplicate block the tail core may see when the block count does not
        # split evenly across the parallel axis).
        blk = p * blocks_per_core + i
        row_ids = blk * tm + lax.broadcasted_iota(jnp.int32, (tm, 1), 0)
        valid = row_ids < n_rows                                    # (tm, 1)

        x_nat = x_ref[...]                                 # (tm, c) native dtype
        t = t_ref[...]                                     # (tm, 1) int32
        m = m_ref[...].astype(jnp.float32)                 # (tm, 1)

        # max is exact in the native dtype; upcast the tile once for exp.
        x_max = jnp.max(x_nat, axis=1, keepdims=True).astype(jnp.float32)
        x32 = x_nat.astype(jnp.float32)
        d = x32 - x_max

        if use_bf16_exp:
            # Gated fast path (~1e-3 relative loss error): bf16 EUP exp + MXU
            # class-sum accumulated in f32.  Not recommended on v5e.
            pexp = jnp.exp(d.astype(jnp.bfloat16))
            if mxu_aligned:
                sum_exp = jnp.dot(pexp, jnp.ones((c, 1), jnp.bfloat16),
                                  preferred_element_type=jnp.float32)
            else:
                sum_exp = jnp.sum(pexp.astype(jnp.float32), axis=1,
                                  keepdims=True)
        else:
            sum_exp = jnp.sum(jnp.exp(d), axis=1, keepdims=True)
        lse = jnp.log(sum_exp) + x_max                              # (tm, 1)

        # Target-logit gather via iota-compare select.
        col = lax.broadcasted_iota(jnp.int32, (tm, c), 1)
        if gather_on_mxu:
            # Select on the native bf16 tile; reduce on the idle MXU (exact,
            # since exactly one element per row is non-zero).
            sel = jnp.where(col == t, x_nat, jnp.zeros((), x_nat.dtype))
            tgt = jnp.dot(sel, jnp.ones((c, 1), x_nat.dtype),
                          preferred_element_type=jnp.float32)
        else:
            sel = jnp.where(col == t, x32, 0.0)
            tgt = jnp.sum(sel, axis=1, keepdims=True)

        nll = lse - tgt                                             # (tm, 1)
        # SELECT on validity (not a multiply): tail-row logits are undefined
        # and may be Inf/NaN; padded/invalid rows must contribute exactly 0.
        contrib = jnp.where(valid, nll * m, 0.0)
        o_ref[...] += jnp.sum(contrib)

    return kernel


def cross_entropy_mask_label(inputs, targets, masks=None, *, block_rows=None,
                             use_bf16_exp=False, num_parallel=2):
    """JAX/Pallas equivalent of CrossEntropyMaskLabel.forward.

    inputs:  (N, C) float logits (f32 or bf16 — streamed in native dtype)
    targets: (N,)   int class labels
    masks:   (N,)   optional per-row mask / weight (defaults to ones)
    returns: scalar float32 loss
    """
    if masks is None:
        masks = jnp.ones_like(targets)
    assert masks.shape == targets.shape

    n, c = inputs.shape
    x = inputs                                    # native dtype, no pad, no copy
    t2 = targets.astype(jnp.int32).reshape(n, 1)
    m2 = masks.astype(jnp.float32).reshape(n, 1)

    tm, vmem_limit = _choose_block_rows(n, c)
    if block_rows is not None:
        tm = min(max(8, (int(block_rows) // 8) * 8), _round_up(n, 8))

    n_blocks = pl.cdiv(n, tm)
    p_dim = num_parallel if n_blocks >= num_parallel else 1
    bpc = pl.cdiv(n_blocks, p_dim)                # row blocks per parallel slice

    # Clamp so the DMA block index never leaves the array; the in-kernel
    # row-validity select zeroes any duplicated / ragged rows.
    def row_block(p, i):
        return (jnp.minimum(p * bpc + i, n_blocks - 1), 0)

    kernel = _make_kernel(n, tm, c, bpc, use_bf16_exp, x.dtype)

    partial = pl.pallas_call(
        kernel,
        out_shape=jax.ShapeDtypeStruct((p_dim, 1, 1), jnp.float32),
        grid_spec=pltpu.PrefetchScalarGridSpec(
            num_scalar_prefetch=0,
            grid=(p_dim, bpc),
            in_specs=[
                pl.BlockSpec((tm, c), row_block),     # logits tile (native dtype)
                pl.BlockSpec((tm, 1), row_block),     # targets tile
                pl.BlockSpec((tm, 1), row_block),     # mask tile
            ],
            # Per-core resident accumulator block (constant across the
            # reduction axis i).
            out_specs=pl.BlockSpec((1, 1, 1), lambda p, i: (p, 0, 0)),
        ),
        compiler_params=pltpu.CompilerParams(
            dimension_semantics=("parallel", "arbitrary"),
            vmem_limit_bytes=vmem_limit,
        ),
    )(x, t2, m2)

    total_loss = jnp.sum(partial)
    # Valid-row count on the tiny (N,) mask — done in plain XLA, not the kernel.
    valid_num = jnp.sum(masks != 0).astype(jnp.float32)
    return total_loss / (jnp.float32(1e-8) + valid_num)


def _reference(inputs, targets, masks=None):
    # Pure-JAX reference mirroring the PyTorch module.
    if masks is None:
        masks = jnp.ones_like(targets)
    masks = masks.astype(jnp.float32)
    x = inputs.astype(jnp.float32)
    log_probs = jax.nn.log_softmax(x, axis=1)
    onehot = jax.nn.one_hot(targets, x.shape[1], dtype=jnp.float32)
    loss = -(onehot * log_probs).sum(axis=1)
    valid = jnp.sum(masks != 0).astype(jnp.float32)
    return (loss * masks).sum(axis=0) / (1e-8 + valid)


if __name__ == "__main__":
    key = jax.random.PRNGKey(0)
    k1, k2, k3, k4 = jax.random.split(key, 4)

    # Case 1: small f32 logits with an explicit mask (some invalid samples).
    N, C = 8, 16
    x = jax.random.normal(k1, (N, C), dtype=jnp.float32)
    t = jax.random.randint(k2, (N,), 0, C, dtype=jnp.int32)
    m = jnp.array([1, 1, 0, 1, 1, 0, 1, 1], dtype=jnp.float32)
    out = jax.block_until_ready(cross_entropy_mask_label(x, t, m))
    ref = _reference(x, t, m)
    assert jnp.allclose(out, ref, atol=1e-5, rtol=1e-5), (out, ref)

    # Case 2: masks=None default path.
    out2 = jax.block_until_ready(cross_entropy_mask_label(x, t))
    ref2 = _reference(x, t)
    assert jnp.allclose(out2, ref2, atol=1e-5, rtol=1e-5), (out2, ref2)

    # Case 3: bf16 logits, N not a multiple of the tile, 2-way parallel grid
    # with a ragged + clamped tail block (N=300, TM=64 -> 5 row blocks split
    # 3/2 across the parallel axis).  Exercises the unpadded-logits tail path,
    # cross-block accumulation, and the bf16 MXU target-gather.
    N3, C3 = 300, 128
    x3 = jax.random.normal(k3, (N3, C3), dtype=jnp.bfloat16)
    t3 = jax.random.randint(k4, (N3,), 0, C3, dtype=jnp.int32)
    m3 = (jnp.arange(N3) % 7 != 0).astype(jnp.float32)
    out3 = jax.block_until_ready(cross_entropy_mask_label(x3, t3, m3, block_rows=64))
    ref3 = _reference(x3, t3, m3)
    assert jnp.allclose(out3, ref3, atol=1e-4, rtol=1e-4), (out3, ref3)

    print("KERNEL_OK")
</pallas_src>

<mosaic_0001>
module attributes {stable_mosaic.version = 11 : i64} {
  func.func @kernel(%arg0: i32, %arg1: i32, %arg2: memref<8x16xf32, #tpu.memory_space<vmem>>, %arg3: memref<8x1xi32, #tpu.memory_space<vmem>>, %arg4: memref<8x1xf32, #tpu.memory_space<vmem>>, %arg5: memref<1x1x1xf32, #tpu.memory_space<vmem>>) attributes {dimension_semantics = [#tpu.dimension_semantics<parallel>, #tpu.dimension_semantics<arbitrary>], iteration_bounds = array<i64: 1, 1>, scalar_prefetch = 0 : i64, scratch_operands = 0 : i64, tpu.core_type = #tpu.core_type<tc>, window_params = [{transform_indices = @transform_0, window_bounds = array<i64: 8, 16>}, {transform_indices = @transform_1, window_bounds = array<i64: 8, 1>}, {transform_indices = @transform_2, window_bounds = array<i64: 8, 1>}, {transform_indices = @transform_3, window_bounds = array<i64: 1, 1, 1>}]} {
    %c0_i32 = arith.constant 0 : i32
    %0 = arith.cmpi eq, %arg1, %c0_i32 : i32
    %1 = arith.extui %0 : i1 to i32
    %c0_i32_0 = arith.constant 0 : i32
    %2 = arith.cmpi ne, %1, %c0_i32_0 : i32
    scf.if %2 {
      %cst_18 = arith.constant 0.000000e+00 : f32
      %42 = vector.broadcast %cst_18 : f32 to vector<1x1x1xf32>
      %c0_19 = arith.constant 0 : index
      %c0_20 = arith.constant 0 : index
      %c0_21 = arith.constant 0 : index
      %43 = vector.load %arg5[%c0_19, %c0_20, %c0_21] : memref<1x1x1xf32, #tpu.memory_space<vmem>>, vector<1x1x1xf32>
      tpu.vector_store %arg5[%c0_19, %c0_20, %c0_21], %42 {strides = array<i32>} : memref<1x1x1xf32, #tpu.memory_space<vmem>>, vector<1x1x1xf32>,
    } else {
    }
    %c1_i32 = arith.constant 1 : i32
    %3 = arith.muli %arg0, %c1_i32 : i32
    %4 = arith.addi %3, %arg1 : i32
    %c8_i32 = arith.constant 8 : i32
    %5 = arith.muli %4, %c8_i32 : i32
    %6 = tpu.iota {dimensions = array<i32: 0>} : vector<8x1xi32>
    %7 = vector.broadcast %5 : i32 to vector<8x1xi32>
    %8 = arith.addi %7, %6 : vector<8x1xi32>
    %c8_i32_1 = arith.constant 8 : i32
    %9 = vector.broadcast %c8_i32_1 : i32 to vector<8x1xi32>
    %10 = arith.cmpi slt, %8, %9 : vector<8x1xi32>
    %c0 = arith.constant 0 : index
    %c0_2 = arith.constant 0 : index
    %11 = vector.load %arg2[%c0, %c0_2] : memref<8x16xf32, #tpu.memory_space<vmem>>, vector<8x16xf32>
    %c0_3 = arith.constant 0 : index
    %c0_4 = arith.constant 0 : index
    %12 = vector.load %arg3[%c0_3, %c0_4] : memref<8x1xi32, #tpu.memory_space<vmem>>, vector<8x1xi32>
    %c0_5 = arith.constant 0 : index
    %c0_6 = arith.constant 0 : index
    %13 = vector.load %arg4[%c0_5, %c0_6] : memref<8x1xf32, #tpu.memory_space<vmem>>, vector<8x1xf32>
    %cst = arith.constant dense<0xFF800000> : vector<8xf32>
    %14 = vector.multi_reduction <maximumf>, %11, %cst [1] : vector<8x16xf32> to vector<8xf32>
    %15 = vector.shape_cast %14 : vector<8xf32> to vector<8x1xf32>
    %16 = vector.broadcast %15 : vector<8x1xf32> to vector<8x16xf32>
    %17 = arith.subf %11, %16 : vector<8x16xf32>
    %18 = math.exp %17 : vector<8x16xf32>
    %cst_7 = arith.constant dense<0.000000e+00> : vector<8xf32>
    %19 = vector.multi_reduction <add>, %18, %cst_7 [1] : vector<8x16xf32> to vector<8xf32>
    %20 = vector.shape_cast %19 : vector<8xf32> to vector<8x1xf32>
    %21 = math.log %20 : vector<8x1xf32>
    %22 = arith.addf %21, %15 : vector<8x1xf32>
    %23 = tpu.iota {dimensions = array<i32: 1>} : vector<8x16xi32>
    %24 = vector.broadcast %12 : vector<8x1xi32> to vector<8x16xi32>
    %25 = arith.cmpi eq, %23, %24 : vector<8x16xi32>
    %cst_8 = arith.constant 0.000000e+00 : f32
    %26 = vector.broadcast %cst_8 : f32 to vector<8x16xf32>
    %27 = arith.select %25, %11, %26 : vector<8x16xi1>, vector<8x16xf32>
    %cst_9 = arith.constant dense<0.000000e+00> : vector<8xf32>
    %28 = vector.multi_reduction <add>, %27, %cst_9 [1] : vector<8x16xf32> to vector<8xf32>
    %29 = vector.shape_cast %28 : vector<8xf32> to vector<8x1xf32>
    %30 = arith.subf %22, %29 : vector<8x1xf32>
    %31 = arith.mulf %30, %13 : vector<8x1xf32>
    %cst_10 = arith.constant 0.000000e+00 : f32
    %32 = vector.broadcast %cst_10 : f32 to vector<8x1xf32>
    %33 = arith.select %10, %31, %32 : vector<8x1xi1>, vector<8x1xf32>
    %c0_11 = arith.constant 0 : index
    %c0_12 = arith.constant 0 : index
    %c0_13 = arith.constant 0 : index
    %34 = vector.load %arg5[%c0_11, %c0_12, %c0_13] : memref<1x1x1xf32, #tpu.memory_space<vmem>>, vector<1x1x1xf32>
    %35 = vector.shape_cast %33 : vector<8x1xf32> to vector<1x8x1xf32>
    %cst_14 = arith.constant dense<0.000000e+00> : vector<1xf32>
    %36 = vector.multi_reduction <add>, %35, %cst_14 [1, 2] : vector<1x8x1xf32> to vector<1xf32>
    %37 = vector.shape_cast %36 : vector<1xf32> to vector<1x1x1xf32>
    %38 = vector.extract %37[0, 0, 0] : f32 from vector<1x1x1xf32>
    %39 = vector.broadcast %38 : f32 to vector<1x1x1xf32>
    %40 = arith.addf %34, %39 : vector<1x1x1xf32>
    %c0_15 = arith.constant 0 : index
    %c0_16 = arith.constant 0 : index
    %c0_17 = arith.constant 0 : index
    %41 = vector.load %arg5[%c0_15, %c0_16, %c0_17] : memref<1x1x1xf32, #tpu.memory_space<vmem>>, vector<1x1x1xf32>
    tpu.vector_store %arg5[%c0_15, %c0_16, %c0_17], %40 {strides = array<i32>} : memref<1x1x1xf32, #tpu.memory_space<vmem>>, vector<1x1x1xf32>,
    return
  }
  func.func @transform_0(%arg0: i32, %arg1: i32) -> (i32, i32) {
    %c1_i32 = arith.constant 1 : i32
    %0 = arith.muli %arg0, %c1_i32 : i32
    %1 = arith.addi %0, %arg1 : i32
    %c0_i32 = arith.constant 0 : i32
    %2 = arith.minsi %1, %c0_i32 : i32
    %c0_i32_0 = arith.constant 0 : i32
    %c0_i32_1 = arith.constant 0 : i32
    return %2, %c0_i32_0 : i32, i32
  }
  func.func @transform_1(%arg0: i32, %arg1: i32) -> (i32, i32) {
    %c1_i32 = arith.constant 1 : i32
    %0 = arith.muli %arg0, %c1_i32 : i32
    %1 = arith.addi %0, %arg1 : i32
    %c0_i32 = arith.constant 0 : i32
    %2 = arith.minsi %1, %c0_i32 : i32
    %c0_i32_0 = arith.constant 0 : i32
    %c0_i32_1 = arith.constant 0 : i32
    return %2, %c0_i32_0 : i32, i32
  }
  func.func @transform_2(%arg0: i32, %arg1: i32) -> (i32, i32) {
    %c1_i32 = arith.constant 1 : i32
    %0 = arith.muli %arg0, %c1_i32 : i32
    %1 = arith.addi %0, %arg1 : i32
    %c0_i32 = arith.constant 0 : i32
    %2 = arith.minsi %1, %c0_i32 : i32
    %c0_i32_0 = arith.constant 0 : i32
    %c0_i32_1 = arith.constant 0 : i32
    return %2, %c0_i32_0 : i32, i32
  }
  func.func @transform_3(%arg0: i32, %arg1: i32) -> (i32, i32, i32) {
    %c0_i32 = arith.constant 0 : i32
    %c0_i32_0 = arith.constant 0 : i32
    %c0_i32_1 = arith.constant 0 : i32
    return %arg0, %c0_i32, %c0_i32_0 : i32, i32, i32
  }
}

</mosaic_0001>

<bundles_post_ra>
// kernel: tpu_custom_call.1
= control target key start
LH: loop header
LB: loop body
LE: loop exit
PB: predicated region body
PF: predicated region fallthrough
CT: control target
= control target key end

     0   :  { %8 = vsyncpa [#allocation3], 0  ;;  %s340_s0 = inlined_call_operand.hbm [shape: f32[8,16], index: 0, kind: input, shape index: {}]   ;;  %s341_s1 = inlined_call_operand.hbm [shape: s32[8,1], index: 1, kind: input, shape index: {}]   ;;  %s342_s2 = inlined_call_operand.hbm [shape: f32[8,1], index: 2, kind: input, shape index: {}]   ;;  %s343_s3 = inlined_call_operand.hbm [shape: f32[1,1,1], index: 3, kind: output, shape index: {}]  }
   0x1   :  { %9 = vsyncpa [#allocation6], 0 }
   0x2   :  { %10 = vsyncpa [#allocation4], 0  ;;  %s261_s12 = smov [#allocation5]   ;;  %s262_s14 = smov [#allocation2]  }
   0x3   :  { %s37_s13 = sshll.u32 %s261_s12, 4  ;;  %s22_s15 = sshll.u32 %s262_s14, 4  ;;  %s38_s13 = int_to_ptr.vmem [resolvable:$true] %s37_s13  ;;  %s23_s15 = int_to_ptr.vmem [resolvable:$true] %s22_s15 }
   0x4   :  { %s167_s18 = scalar_lea.hbm %s341_s1, 128 }
   0x5   :  { %p168_p0 = scmp.ne.s32.totalorder %s341_s1, %s167_s18  ;;  %p171_p1 = scmp.lt.u32.totalorder %s167_s18, %s341_s1 }
   0x7   :  { %p173_p2 = pnand %p171_p1, %p168_p0 }
   0x9   :  { %176 = shalt.err (!%p173_p2)
}
   0xa   :  { %s177_s23 = scalar_lea.vmem %s38_s13, 128  ;;  %p182_p4 = scmp.lt.s32.totalorder %s38_s13, %s38_s13 }
   0xb   :  { %p178_p3 = scmp.ne.s32.totalorder %s38_s13, %s177_s23  ;;  %p183_p5 = scmp.lt.s32.totalorder %s177_s23, %s177_s23 }
   0xd   :  { %p184_p6 = por %p183_p5, %p182_p4 }
   0xf   :  { %p185_p7 = pnand %p184_p6, %p178_p3 }
  0x11   :  { %188 = shalt.err (!%p185_p7)
}
  0x12   :  { %40 = dma.hbm_to_vmem [thread:$0]  %s341_s1, 128, %s38_s13, [#allocation6]  }
  0x13   :  { %s189_s28 = scalar_lea.hbm %s340_s0, 128 }
  0x14   :  { %p190_p8 = scmp.ne.s32.totalorder %s340_s0, %s189_s28  ;;  %p193_p9 = scmp.lt.u32.totalorder %s189_s28, %s340_s0 }
  0x16   :  { %p195_p10 = pnand %p193_p9, %p190_p8 }
  0x18   :  { %198 = shalt.err (!%p195_p10)
}
  0x19   :  { %s199_s6 = scalar_lea.vmem %s23_s15, 128  ;;  %p204_p12 = scmp.lt.s32.totalorder %s23_s15, %s23_s15 }
  0x1a   :  { %p200_p11 = scmp.ne.s32.totalorder %s23_s15, %s199_s6  ;;  %p205_p13 = scmp.lt.s32.totalorder %s199_s6, %s199_s6 }
  0x1c   :  { %p206_p0 = por %p205_p13, %p204_p12 }
  0x1e   :  { %p207_p1 = pnand %p206_p0, %p200_p11 }
  0x20   :  { %210 = shalt.err (!%p207_p1)
}
  0x21   :  { %25 = dma.hbm_to_vmem [thread:$0]  %s340_s0, 128, %s23_s15, [#allocation3]  }
  0x22   :  { %s263_s8 = smov [#allocation7]   ;;  %s211_s12 = scalar_lea.hbm %s342_s2, 128 }
  0x23   :  { %s52_s9 = sshll.u32 %s263_s8, 4  ;;  %p212_p2 = scmp.ne.s32.totalorder %s342_s2, %s211_s12  ;;  %s53_s9 = int_to_ptr.vmem [resolvable:$true] %s52_s9 }
  0x24   :  { %p215_p3 = scmp.lt.u32.totalorder %s211_s12, %s342_s2 }
  0x26   :  { %p217_p4 = pnand %p215_p3, %p212_p2 }
  0x28   :  { %220 = shalt.err (!%p217_p4)
}
  0x29   :  { %s221_s18 = scalar_lea.vmem %s53_s9, 128  ;;  %p226_p6 = scmp.lt.s32.totalorder %s53_s9, %s53_s9 }
  0x2a   :  { %p222_p5 = scmp.ne.s32.totalorder %s53_s9, %s221_s18  ;;  %p227_p7 = scmp.lt.s32.totalorder %s221_s18, %s221_s18 }
  0x2c   :  { %p228_p8 = por %p227_p7, %p226_p6 }
  0x2e   :  { %p229_p9 = pnand %p228_p8, %p222_p5 }
  0x30   :  { %232 = shalt.err (!%p229_p9)
}
  0x31   :  { %55 = dma.hbm_to_vmem [thread:$0]  %s342_s2, 128, %s53_s9, [#allocation6]  }
  0x32   :  { %255 = dma.done.wait [#allocation3], 128  }
  0x33   :  { %256 = vsyncadd [#allocation3], 4294967168 }
  0x34   :  { %257 = dma.done.wait [#allocation6], 256  }
  0x35   :  { %258 = vsyncadd [#allocation6], 4294967040  ;;  %vm78_vm0 = vcmask 0   ;;  %v264_v0 = vmov 0.0   ;;  %v265_v1 = vmov 0   ;;  %vm90_vm1 = vcmask 130048  }
  0x36   :  { %79 = vst.msk [vmem:[#allocation8] sm:$0x1] %vm78_vm0, %v264_v0  ;;  %162 = vset.pattern.permute.xlu0 %v265_v1  ;;  %v87_v2 = vld [vmem:[#allocation2] sm:$0xff]  ;;  %v88_v4 = vld [vmem:[#allocation5] sm:$0xff]  ;;  %v103_v8 = vlaneseq  ;;  %v89_v20 = vld [vmem:[#allocation7] sm:$0xff]  ;;  %vm117_vm3 = vcmask 7168  }
  0x37   :  { %v91_v3 = vsel %vm90_vm1, %v87_v2, -inf  ;;  %s266_s2 = smov [#allocation8]  }
  0x38   :  { %92 = vmax.xlane.f32.xlu0 %v91_v3  ;;  %v104_v9 = vand.u32 127, %v103_v8  ;;  %s138_s19 = sshll.u32 %s266_s2, 4  ;;  %s139_s19 = int_to_ptr.vmem [resolvable:$true] %s138_s19 }
  0x39   :  { %s233_s21 = scalar_lea.vmem %s139_s19, 16  ;;  %s237_s22 = scalar_lea.vmem %s139_s19, 32 }
  0x3a   :  { %p234_p10 = scmp.ne.s32.totalorder %s139_s19, %s233_s21  ;;  %p238_p11 = scmp.lt.s32.totalorder %s139_s19, %s139_s19 }
  0x3b   :  { %p239_p12 = scmp.lt.s32.totalorder %s237_s22, %s233_s21 }
  0x3d   :  { %v116_v31 = vld [vmem:[#allocation8] sm:$0x1]  ;;  %p240_p13 = por %p239_p12, %p238_p11 }
  0x3f   :  { %p241_p0 = pnand %p240_p13, %p234_p10 }
  0x4e   :  { %106 = vperm.xlu0 %162, %v88_v4  }
  0xc5   :  { %v93_v5 = vpop.xlane.xlu0 %92 }
  0xc6   :  { %v94_v6 = vsub.f32 %v87_v2, %v93_v5 }
  0xc8   :  { %v95_v7 = vmul.f32 1.442695, %v94_v6 }
  0xca   :  { %163 = vpow2.f32 %v95_v7 }
  0xcd   :  { %v107_v10 = vpop.permute.xlu0 %106 }
  0xce   :  { %vm108_vm2 = vcmp.eq.s32.totalorder %v104_v9, %v107_v10 }
  0xcf   :  { %v109_v12 = vsel %vm108_vm2, %v87_v2, 0.0 }
  0xd0   :  { %v110_v14 = vsel %vm90_vm1, %v109_v12, 0.0 }
  0xd4   :  { %v164_v11 = vpop.eup %163 }
  0xd5   :  { %v97_v13 = vsel %vm90_vm1, %v164_v11, 0.0 }
  0xd6   :  { %98 = vadd.xlane.f32.xlu1 %v97_v13 }
  0xda   :  { %111 = vadd.xlane.f32.xlu1 %v110_v14 }
 0x163   :  { %v99_v15 = vpop.xlane.xlu1 %98 }
 0x164   :  { %165 = vlog2.f32 %v99_v15 }
 0x167   :  { %v112_v18 = vpop.xlane.xlu1 %111 }
 0x16e   :  { %v166_v16 = vpop.eup %165 }
 0x16f   :  { %v101_v17 = vmul.f32 0.6931472, %v166_v16 }
 0x171   :  { %v102_v19 = vadd.f32 %v101_v17, %v93_v5 }
 0x173   :  { %v113_v21 = vsub.f32 %v102_v19, %v112_v18 }
 0x175   :  { %v114_v22 = vmul.f32 %v113_v21, %v89_v20 }
 0x177   :  { %v118_v23 = vsel %vm117_vm3, %v114_v22, 0.0 }
 0x178   :  { %119 = vadd.xlane.f32.xlu1 %v118_v23 }
 0x205   :  { %v120_v24 = vpop.xlane.xlu1 %119 }
 0x206   :  { %v121_v25 = vrot.slane %v120_v24, 4 }
 0x208   :  { %v122_v26 = vadd.f32 %v121_v25, %v120_v24 }
 0x20a   :  { %v123_v27 = vrot.slane %v122_v26, 2 }
 0x20c   :  { %v124_v28 = vadd.f32 %v123_v27, %v122_v26 }
 0x20e   :  { %v125_v29 = vrot.slane %v124_v28, 1 }
 0x210   :  { %v126_v30 = vadd.f32 %v125_v29, %v124_v28 }
 0x212   :  { %154 = vpush %v126_v30 }
 0x243   :  { %s155_s20 = spop %154 }
 0x244   :  { %v128_v32 = vstv %s155_s20 }
 0x245   :  { %v129_v33 = vadd.f32 %v128_v32, %v116_v31 }
 0x247   :  { %131 = vst.msk [vmem:[#allocation8] sm:$0x1] %vm78_vm0, %v129_v33 }
 0x248   :  { %244 = shalt.err (!%p241_p0)
}
 0x249   :  { %s245_s25 = scalar_lea.hbm %s343_s3, 16 }
 0x24a   :  { %p246_p1 = scmp.ne.s32.totalorder %s343_s3, %s245_s25  ;;  %p249_p2 = scmp.lt.u32.totalorder %s245_s25, %s343_s3 }
 0x24c   :  { %p251_p3 = pnand %p249_p2, %p246_p1 }
 0x24e   :  { %254 = shalt.err (!%p251_p3)
}
 0x24f   :  { %141 = dma.vmem_to_hbm [thread:$0]  %s139_s19, 16, %s343_s3, [#allocation4]  }
 0x250   :  { %259 = dma.done.wait [#allocation4], 16  }
 0x251   :  { %260 = vsyncadd [#allocation4], 4294967280 }
 0x252   :  { %145 = vsyncpa [#allocation3], 1 }
 0x253   :  { %146 = vsyncpa [#allocation6], 1 }
 0x254   :  { %147 = vsyncpa [#allocation4], 1 }

</bundles_post_ra>
